<compile_context>
chip_gen: v7x
topology: tpu7x:2x2x1
jax: 0.10.0
libtpu: 0.0.40
codegen_flags: <defaults>
</compile_context>

<pallas_src>
import functools

import numpy as np
import jax
import jax.numpy as jnp
from jax.experimental import pallas as pl
from jax.experimental.pallas import tpu as pltpu

EPS = 1e-6  # n_norm epsilon


# --------------------------------------------------------------------------- helpers
def _round_up(v, m):
    return ((v + m - 1) // m) * m


def _prefer_256():
    """256-wide tiles only pay off on the 256x256 MXU generations (v6e/v7x)."""
    try:
        kind = jax.devices()[0].device_kind.lower()
    except Exception:
        return True
    return not any(tag in kind for tag in ("v2", "v3", "v4", "v5"))


def _pick_tile(dim, prefer_256):
    """Return 128 or 256; only take 256 when it does not increase padding."""
    if prefer_256 and dim > 128 and _round_up(dim, 256) == _round_up(dim, 128):
        return 256
    return 128


def _pow_n(v, n):
    """v ** n. Integer n >= 1 uses a repeated-squaring chain (VALU muls only)."""
    ni = int(round(n))
    if abs(n - ni) < 1e-12 and ni >= 1:
        result, base, e = None, v, ni
        while e:
            if e & 1:
                result = base if result is None else result * base
            e >>= 1
            if e:
                base = base * base
        return result
    return v ** n


def _nth_root(v, n):
    """v ** (1/n). Powers of two in n become a sqrt chain (no generic pow)."""
    ni = int(round(n))
    if abs(n - ni) < 1e-12 and ni >= 1:
        m = ni
        while m % 2 == 0:
            v = jnp.sqrt(v)
            m //= 2
        return v if m == 1 else v ** (1.0 / m)
    return v ** (1.0 / n)


def _vmem_limit(est_bytes):
    # Ask for 2x the static estimate but cap at 48 MiB (headroom on v7x 64 MiB).
    return int(min(max(2 * est_bytes, 32 << 20), 48 << 20))


# --------------------------------------------------------------------------- kernels
def _sn_kernel(x_ref, w_ref, b_ref, sn_ref, *, n):
    """s^n = sigmoid(x @ W + b) ** n for one (batch-tile, U-tile)."""
    logits = jnp.dot(x_ref[...], w_ref[...], preferred_element_type=jnp.float32)
    s = jax.nn.sigmoid(logits + b_ref[...])          # f32, EUP exp
    sn_ref[...] = _pow_n(s, n).astype(sn_ref.dtype)


def _norm_kernel(sn_ref, r_ref, o_ref, *, n):
    """out = clip((s^n) @ (R^n), eps, 1-eps) ** (1/n), reduced over U tiles."""
    k = pl.program_id(2)
    partial = jnp.dot(sn_ref[...], r_ref[...], preferred_element_type=jnp.float32)

    @pl.when(k == 0)
    def _():
        o_ref[...] = partial                         # init: write, no zero pass

    @pl.when(k > 0)
    def _():
        o_ref[...] += partial                        # accumulate in output block

    @pl.when(k == pl.num_programs(2) - 1)
    def _():
        o_ref[...] = _nth_root(jnp.clip(o_ref[...], EPS, 1.0 - EPS), n)


# --------------------------------------------------------------------------- wrapper
def awx_prepare(w, b, r_t, *, n=2, tc=None, tk=None,
                mxu_dtype=jnp.bfloat16, r_dtype=jnp.float32,
                sn_dtype=jnp.float32):
    """One-time (model-init) preprocessing, hoisted out of the per-call path.

    w   : (D, U) linear weight          b : (U,) bias or None
    r_t : (C, U) hierarchy matrix R_t (must be non-negative, usually binary)

    mxu_dtype : operand dtype of the first GEMM (x, W); bf16 is fast & accurate
                enough since accumulation is f32.
    r_dtype / sn_dtype : operand dtypes of the second GEMM (R^n and s^n).
                Default f32 = exact for a binary R; set bf16 for extra speed.
    """
    assert n > 1, "only the n-norm (n > 1) branch is implemented"
    w = np.asarray(w, np.float32)
    r_t = np.asarray(r_t, np.float32)
    assert (r_t >= 0).all(), "the (s*R_t)^n == s^n * R^n rewrite needs R_t >= 0"
    D, U = w.shape
    C, U2 = r_t.shape
    assert U2 == U

    prefer_256 = _prefer_256()
    tk = tk if tk is not None else _pick_tile(U, prefer_256)
    tc = tc if tc is not None else _pick_tile(C, prefer_256)
    assert tk % 128 == 0 and tc % 128 == 0

    D_p = _round_up(D, 8)            # full-D blocks -> only 8-alignment needed
    U_p = _round_up(U, tk)
    C_p = _round_up(C, tc)

    w_p = np.zeros((D_p, U_p), np.float32)
    w_p[:D, :U] = w
    b_p = np.zeros((1, U_p), np.float32)
    if b is not None:
        b_p[0, :U] = np.asarray(b, np.float32)
    r_p = np.zeros((U_p, C_p), np.float32)
    r_p[:U, :C] = r_t.T ** n         # pre-powered (no-op for a binary R)

    return dict(
        w=jnp.asarray(w_p, mxu_dtype), b=jnp.asarray(b_p),
        r=jnp.asarray(r_p, r_dtype),
        n=n, tc=tc, tk=tk,
        mxu_dtype=jnp.dtype(mxu_dtype), sn_dtype=jnp.dtype(sn_dtype),
        D=D, U=U, C=C, D_p=D_p, U_p=U_p, C_p=C_p,
    )


def hierarchical_awx(x, params, *, tm=None):
    """x: (B, D) float; params from awx_prepare. Returns (B, C) float32."""
    B, D = x.shape
    assert D == params["D"]
    n = params["n"]
    tc, tk = params["tc"], params["tk"]
    D_p, U_p, C_p = params["D_p"], params["U_p"], params["C_p"]
    if tm is None:
        tm = min(256, _round_up(B, 8))         # large tm amortizes per-step cost
    tm = _round_up(tm, 8)
    B_p = _round_up(B, tm)

    x_p = jnp.zeros((B_p, D_p), jnp.float32).at[:B, :D].set(
        jnp.asarray(x, jnp.float32)).astype(params["mxu_dtype"])

    in_b = params["mxu_dtype"].itemsize
    sn_b = params["sn_dtype"].itemsize
    r_b = params["r"].dtype.itemsize

    # ---- stage 1: s^n = sigmoid(x @ W + b)^n -------------------------------
    vmem1 = 2 * (tm * D_p * in_b + D_p * tk * in_b + tk * 4 + tm * tk * sn_b)
    s_n = pl.pallas_call(
        functools.partial(_sn_kernel, n=n),
        out_shape=jax.ShapeDtypeStruct((B_p, U_p), params["sn_dtype"]),
        grid_spec=pltpu.PrefetchScalarGridSpec(
            num_scalar_prefetch=0,
            grid=(B_p // tm, U_p // tk),
            in_specs=[
                pl.BlockSpec((tm, D_p), lambda i, k: (i, 0)),   # x tile (full D)
                pl.BlockSpec((D_p, tk), lambda i, k: (0, k)),   # W tile
                pl.BlockSpec((1, tk), lambda i, k: (0, k)),     # bias tile
            ],
            out_specs=pl.BlockSpec((tm, tk), lambda i, k: (i, k)),
        ),
        compiler_params=pltpu.CompilerParams(
            dimension_semantics=("parallel", "parallel"),
            vmem_limit_bytes=_vmem_limit(vmem1),
        ),
    )(x_p, params["w"], params["b"])

    # ---- stage 2: out = clip(s^n @ R^n, eps, 1-eps)^(1/n), U reduced last ---
    vmem2 = 2 * (tm * tk * sn_b + tk * tc * r_b + tm * tc * 4)
    out = pl.pallas_call(
        functools.partial(_norm_kernel, n=n),
        out_shape=jax.ShapeDtypeStruct((B_p, C_p), jnp.float32),
        grid_spec=pltpu.PrefetchScalarGridSpec(
            num_scalar_prefetch=0,
            grid=(B_p // tm, C_p // tc, U_p // tk),
            in_specs=[
                pl.BlockSpec((tm, tk), lambda i, j, k: (i, k)),  # s^n tile
                pl.BlockSpec((tk, tc), lambda i, j, k: (k, j)),  # R^n tile
            ],
            out_specs=pl.BlockSpec((tm, tc), lambda i, j, k: (i, j)),
        ),
        compiler_params=pltpu.CompilerParams(
            dimension_semantics=("parallel", "parallel", "arbitrary"),
            vmem_limit_bytes=_vmem_limit(vmem2),
        ),
    )(s_n, params["r"])
    return out[:B, :params["C"]]


# --------------------------------------------------------------------------- reference & test harness
def _reference(x, w, b, r_t, n=2):
    """Pure-JAX reference of the original torch formulation (n > 1 branch)."""
    s = jax.nn.sigmoid(
        jnp.matmul(x, w, precision=jax.lax.Precision.HIGHEST) + b)
    prod = s[:, None, :] * r_t[None, :, :]
    ssum = jnp.sum(prod ** n, axis=-1)
    return jnp.clip(ssum, EPS, 1.0 - EPS) ** (1.0 / n)


def build_hierarchy():
    """Small synthetic class hierarchy (replaces hparams.class_adj + networkx)."""
    C = 12
    class_adj = np.zeros((C, C), dtype=np.float32)
    # leaves 0..7, internal nodes 8,9,10, root 11
    for child, parent in [(0, 8), (1, 8), (2, 8),
                          (3, 9), (4, 9), (5, 9),
                          (6, 10), (7, 10),
                          (8, 11), (9, 11), (10, 11)]:
        class_adj[child, parent] = 1.0

    leaves = class_adj.sum(0) == 0
    # transitive closure (replaces nx.descendants on the child->parent DiGraph)
    adj = class_adj.astype(bool)
    reach = adj.copy()
    for _ in range(C):
        reach = reach | ((reach.astype(np.int32) @ adj.astype(np.int32)) > 0)

    R = np.zeros((C, C), dtype=np.float32)
    leaf_idx = np.where(leaves)[0]
    R[leaf_idx, leaf_idx] = 1.0
    for i in leaf_idx:
        anc = np.where(reach[i])[0]
        if anc.size:
            R[i, anc] = 1.0
    R_leaves = R[leaves]            # (U, C)
    return class_adj, R_leaves.T.astype(np.float32), int(leaves.sum())


if __name__ == "__main__":
    # ---- case 1: small hierarchy matching the module defaults ----
    B, D = 8, 32                    # batch, embedding_dim
    _, R_t_np, U = build_hierarchy()
    C = R_t_np.shape[0]

    key = jax.random.PRNGKey(0)
    k_x, k_w, k_x2, k_w2, k_b2, k_r2 = jax.random.split(key, 6)

    x = jax.random.normal(k_x, (B, D), dtype=jnp.float32)
    limit = float(np.sqrt(6.0 / (D + U)))       # glorot uniform
    w = jax.random.uniform(k_w, (D, U), jnp.float32, minval=-limit, maxval=limit)
    b = jnp.zeros((U,), dtype=jnp.float32)
    r_t = jnp.asarray(R_t_np)

    ref = jax.block_until_ready(_reference(x, w, b, r_t))

    # all-f32 path: exact (tight tolerance)
    params_f32 = awx_prepare(w, b, r_t, n=2, mxu_dtype=jnp.float32)
    out_f32 = jax.block_until_ready(hierarchical_awx(x, params_f32))
    np.testing.assert_allclose(np.asarray(out_f32), np.asarray(ref),
                               rtol=1e-5, atol=1e-5)

    # default path: bf16 first GEMM, f32 second GEMM (looser tolerance)
    params_def = awx_prepare(w, b, r_t, n=2)
    out_def = jax.block_until_ready(hierarchical_awx(x, params_def))
    np.testing.assert_allclose(np.asarray(out_def), np.asarray(ref),
                               rtol=2e-2, atol=2e-2)

    # ---- case 2: multi-tile grid (exercises init / accumulate / finalize) ----
    B2, D2, U2, C2 = 48, 96, 200, 260
    x2 = jax.random.normal(k_x2, (B2, D2), dtype=jnp.float32)
    limit2 = float(np.sqrt(6.0 / (D2 + U2)))
    w2 = jax.random.uniform(k_w2, (D2, U2), jnp.float32,
                            minval=-limit2, maxval=limit2)
    b2 = 0.1 * jax.random.normal(k_b2, (U2,), dtype=jnp.float32)
    r_t2 = jax.random.bernoulli(k_r2, 0.05, (C2, U2)).astype(jnp.float32)

    params2 = awx_prepare(w2, b2, r_t2, n=2, tc=128, tk=128,
                          mxu_dtype=jnp.float32)
    out2 = jax.block_until_ready(hierarchical_awx(x2, params2))
    ref2 = jax.block_until_ready(_reference(x2, w2, b2, r_t2))
    np.testing.assert_allclose(np.asarray(out2), np.asarray(ref2),
                               rtol=1e-5, atol=1e-5)

    # ---- case 3: n = 4 (exercises the square / sqrt chains) ----
    params4 = awx_prepare(w, b, r_t, n=4, mxu_dtype=jnp.float32)
    out4 = jax.block_until_ready(hierarchical_awx(x, params4))
    ref4 = jax.block_until_ready(_reference(x, w, b, r_t, n=4))
    np.testing.assert_allclose(np.asarray(out4), np.asarray(ref4),
                               rtol=1e-5, atol=1e-5)

    print("KERNEL_OK")
</pallas_src>

<mosaic_0001>
module attributes {stable_mosaic.version = 11 : i64} {
  func.func @_sn_kernel(%arg0: i32, %arg1: i32, %arg2: memref<8x32xf32, #tpu.memory_space<vmem>>, %arg3: memref<32x128xf32, #tpu.memory_space<vmem>>, %arg4: memref<1x128xf32, #tpu.memory_space<vmem>>, %arg5: memref<8x128xf32, #tpu.memory_space<vmem>>) attributes {dimension_semantics = [#tpu.dimension_semantics<parallel>, #tpu.dimension_semantics<parallel>], iteration_bounds = array<i64: 1, 1>, scalar_prefetch = 0 : i64, scratch_operands = 0 : i64, tpu.core_type = #tpu.core_type<tc>, window_params = [{transform_indices = @transform_0, window_bounds = array<i64: 8, 32>}, {transform_indices = @transform_1, window_bounds = array<i64: 32, 128>}, {transform_indices = @transform_2, window_bounds = array<i64: 1, 128>}, {transform_indices = @transform_3, window_bounds = array<i64: 8, 128>}]} {
    %c0 = arith.constant 0 : index
    %c0_0 = arith.constant 0 : index
    %0 = vector.load %arg2[%c0, %c0_0] : memref<8x32xf32, #tpu.memory_space<vmem>>, vector<8x32xf32>
    %c0_1 = arith.constant 0 : index
    %c0_2 = arith.constant 0 : index
    %1 = vector.load %arg3[%c0_1, %c0_2] : memref<32x128xf32, #tpu.memory_space<vmem>>, vector<32x128xf32>
    %cst = arith.constant dense<0.000000e+00> : vector<8x128xf32>
    %2 = tpu.matmul %0, %1, %cst {dimension_numbers = #tpu.dot_dimension_numbers<[1], [0], [0], [1], [0, 0, 1, 1], [], []>} : vector<8x32xf32>, vector<32x128xf32>, vector<8x128xf32> -> vector<8x128xf32>
    %c0_3 = arith.constant 0 : index
    %c0_4 = arith.constant 0 : index
    %3 = vector.load %arg4[%c0_3, %c0_4] : memref<1x128xf32, #tpu.memory_space<vmem>>, vector<1x128xf32>
    %4 = vector.broadcast %3 : vector<1x128xf32> to vector<8x128xf32>
    %5 = arith.addf %2, %4 : vector<8x128xf32>
    %6 = arith.negf %5 : vector<8x128xf32>
    %7 = math.exp %6 : vector<8x128xf32>
    %cst_5 = arith.constant 1.000000e+00 : f32
    %8 = vector.broadcast %cst_5 : f32 to vector<8x128xf32>
    %9 = arith.addf %8, %7 : vector<8x128xf32>
    %10 = arith.divf %8, %9 : vector<8x128xf32>
    %11 = arith.mulf %10, %10 : vector<8x128xf32>
    %c0_6 = arith.constant 0 : index
    %c0_7 = arith.constant 0 : index
    %12 = vector.load %arg5[%c0_6, %c0_7] : memref<8x128xf32, #tpu.memory_space<vmem>>, vector<8x128xf32>
    tpu.vector_store %arg5[%c0_6, %c0_7], %11 {strides = array<i32>} : memref<8x128xf32, #tpu.memory_space<vmem>>, vector<8x128xf32>,
    return
  }
  func.func @transform_0(%arg0: i32, %arg1: i32) -> (i32, i32) {
    %c0_i32 = arith.constant 0 : i32
    %c0_i32_0 = arith.constant 0 : i32
    return %arg0, %c0_i32 : i32, i32
  }
  func.func @transform_1(%arg0: i32, %arg1: i32) -> (i32, i32) {
    %c0_i32 = arith.constant 0 : i32
    %c0_i32_0 = arith.constant 0 : i32
    return %c0_i32, %arg1 : i32, i32
  }
  func.func @transform_2(%arg0: i32, %arg1: i32) -> (i32, i32) {
    %c0_i32 = arith.constant 0 : i32
    %c0_i32_0 = arith.constant 0 : i32
    return %c0_i32, %arg1 : i32, i32
  }
  func.func @transform_3(%arg0: i32, %arg1: i32) -> (i32, i32) {
    %c0_i32 = arith.constant 0 : i32
    return %arg0, %arg1 : i32, i32
  }
}

</mosaic_0001>

<bundles_post_ra>
// kernel: tpu_custom_call.1
= control target key start
LH: loop header
LB: loop body
LE: loop exit
PB: predicated region body
PF: predicated region fallthrough
CT: control target
= control target key end

     0   :  { %8 = vsyncpa [#allocation3], 0  ;;  %s334_s0 = inlined_call_operand.hbm [shape: f32[8,32], index: 0, kind: input, shape index: {}]   ;;  %s335_s1 = inlined_call_operand.hbm [shape: f32[32,128], index: 1, kind: input, shape index: {}]   ;;  %s336_s2 = inlined_call_operand.vmem [shape: f32[1,128], index: 2, kind: input, shape index: {}]   ;;  %s337_s3 = inlined_call_operand.hbm [shape: f32[8,128], index: 3, kind: output, shape index: {}]  }
   0x1   :  { %9 = vsyncpa [#allocation6], 0 }
   0x2   :  { %10 = vsyncpa [#allocation4], 0  ;;  %s260_s12 = smov [#allocation2]   ;;  %s261_s14 = smov [#allocation5]  }
   0x3   :  { %s17_s13 = sshll.u32 %s260_s12, 4  ;;  %s26_s15 = sshll.u32 %s261_s14, 4  ;;  %s18_s13 = int_to_ptr.vmem [resolvable:$true] %s17_s13  ;;  %s288_s15 = int_to_ptr.vmem [resolvable:$true] %s26_s15 }
   0x4   :  { %s188_s18 = scalar_lea.hbm %s334_s0, 128 }
   0x5   :  { %p189_p0 = scmp.ne.s32.totalorder %s334_s0, %s188_s18  ;;  %p192_p1 = scmp.lt.u32.totalorder %s188_s18, %s334_s0 }
   0x7   :  { %p194_p2 = pnand %p192_p1, %p189_p0 }
   0x9   :  { %197 = shalt.err (!%p194_p2)
}
   0xa   :  { %s198_s23 = scalar_lea.vmem %s18_s13, 128  ;;  %p203_p4 = scmp.lt.s32.totalorder %s18_s13, %s18_s13 }
   0xb   :  { %p199_p3 = scmp.ne.s32.totalorder %s18_s13, %s198_s23  ;;  %p204_p5 = scmp.lt.s32.totalorder %s198_s23, %s198_s23 }
   0xd   :  { %p205_p6 = por %p204_p5, %p203_p4 }
   0xf   :  { %p206_p7 = pnand %p205_p6, %p199_p3 }
  0x11   :  { %209 = shalt.err (!%p206_p7)
}
  0x12   :  { %20 = dma.hbm_to_vmem [thread:$0]  %s334_s0, 128, %s18_s13, [#allocation3]  }
  0x13   :  { %s210_s28 = scalar_lea.hbm %s335_s1, 512 }
  0x14   :  { %p211_p8 = scmp.ne.s32.totalorder %s335_s1, %s210_s28  ;;  %p214_p9 = scmp.lt.u32.totalorder %s210_s28, %s335_s1 }
  0x16   :  { %p216_p10 = pnand %p214_p9, %p211_p8 }
  0x18   :  { %219 = shalt.err (!%p216_p10)
}
  0x19   :  { %s220_s6 = scalar_lea.vmem %s288_s15, 512  ;;  %p225_p12 = scmp.lt.s32.totalorder %s288_s15, %s288_s15 }
  0x1a   :  { %p221_p11 = scmp.ne.s32.totalorder %s288_s15, %s220_s6  ;;  %p226_p13 = scmp.lt.s32.totalorder %s220_s6, %s220_s6 }
  0x1c   :  { %p227_p0 = por %p226_p13, %p225_p12 }
  0x1e   :  { %p228_p1 = pnand %p227_p0, %p221_p11 }
  0x20   :  { %231 = shalt.err (!%p228_p1)
}
  0x21   :  { %s262_s0 = smov 128   ;;  %s263_s7 = smov 8  }
  0x22   :  { %32 = dma.hbm_to_vmem [thread:$0]  %s335_s1, 512, %s288_s15, [#allocation6], %s262_s0, %s262_s0, %s263_s7  }
  0x23   :  { %254 = dma.done.wait [#allocation3], 128  }
  0x24   :  { %255 = vsyncadd [#allocation3], 4294967168 }
  0x25   :  { %256 = dma.done.wait [#allocation6], 512  }
  0x26   :  { %257 = vsyncadd [#allocation6], 4294966784  ;;  %v264_v0 = vmov 0.0|0.0   ;;  %vm265_vm0 = vmmov 0   ;;  %v266_v1 = vmov 0.0   ;;  %v42_v2 = vld [vmem:[#allocation5] sm:$0xff] }
  0x27   :  { %170 = vmatprep.subr.bf16.mxu0 %v264_v0  ;;  %167 = vmatprep.mubr.msk.f32.mxu0 %vm265_vm0, %v266_v1  ;;  %v43_v3 = vld [vmem:[#allocation5 + $0x8] sm:$0xff]  ;;  %v44_v4 = vld [vmem:[#allocation5 + $0x10] sm:$0xff]  ;;  %v45_v6 = vld [vmem:[#allocation5 + $0x18] sm:$0xff]  ;;  %vm53_vm1 = vcmask 261120   ;;  %s267_s11 = smov [#allocation7]  }
  0x28   :  { %v171_v5 = vpack.c.bf16 %v43_v3, %v42_v2  ;;  %v174_v7 = vpack.c.bf16 %v45_v6, %v44_v4  ;;  %v41_v8 = vld [vmem:[#allocation2] sm:$0xff]  ;;  %s141_s12 = sshll.u32 %s267_s11, 4  ;;  %s142_s12 = int_to_ptr.vmem [resolvable:$true] %s141_s12 }
  0x29   :  { %v151_v9 = vld [vmem:[%s336_s2] ss:$0 sm:$0xff]  ;;  %s232_s13 = scalar_lea.vmem %s142_s12, 128  ;;  %p237_p3 = scmp.lt.s32.totalorder %s142_s12, %s142_s12 }
  0x2a   :  { %172 = vmatpush3.bf16.msra.mxu0 %v171_v5  ;;  %p233_p2 = scmp.ne.s32.totalorder %s142_s12, %s232_s13  ;;  %p238_p4 = scmp.lt.s32.totalorder %s232_s13, %s232_s13 }
  0x2b   :  { %173 = vmatprep.subr.bf16.mxu0 %v264_v0 }
  0x2c   :  { %p239_p5 = por %p238_p4, %p237_p3 }
  0x2e   :  { %175 = vmatpush3.bf16.msra.mxu0 %v174_v7  ;;  %p240_p6 = pnand %p239_p5, %p233_p2 }
  0x31   :  { %168 = vmatmul.mubr.msk.f32.vlgmr.msra.gmra.mrb[0].mxu0 %vm53_vm1, %v41_v8 }
 0x104   :  { %v123_v10 = vpop.f32.mrb[0].mxu0 }
 0x105   :  { %v124_v11 = vadd.f32 %v151_v9, %v123_v10  ;;  %v169_v12 = vpop.f32.mrb[1].mxu0 }
 0x107   :  { %v153_v13 = vmul.f32 -1.442695, %v124_v11 }
 0x109   :  { %184 = vpow2.f32 %v153_v13 }
 0x113   :  { %v185_v14 = vpop.eup %184 }
 0x114   :  { %v130_v15 = vadd.f32 1.0, %v185_v14 }
 0x116   :  { %186 = vrcp.f32 %v130_v15 }
 0x120   :  { %v187_v16 = vpop.eup %186 }
 0x121   :  { %v133_v17 = vmul.f32 %v187_v16, %v187_v16 }
 0x123   :  { %134 = vst [vmem:[#allocation7] sm:$0xff] %v133_v17 }
 0x124   :  { %243 = shalt.err (!%p240_p6)
}
 0x125   :  { %s244_s15 = scalar_lea.hbm %s337_s3, 128 }
 0x126   :  { %p245_p7 = scmp.ne.s32.totalorder %s337_s3, %s244_s15  ;;  %p248_p8 = scmp.lt.u32.totalorder %s244_s15, %s337_s3 }
 0x128   :  { %p250_p9 = pnand %p248_p8, %p245_p7 }
 0x12a   :  { %253 = shalt.err (!%p250_p9)
}
 0x12b   :  { %144 = dma.vmem_to_hbm [thread:$0]  %s142_s12, 128, %s337_s3, [#allocation4]  }
 0x12c   :  { %258 = dma.done.wait [#allocation4], 128  }
 0x12d   :  { %259 = vsyncadd [#allocation4], 4294967168 }
 0x12e   :  { %148 = vsyncpa [#allocation3], 1 }
 0x12f   :  { %149 = vsyncpa [#allocation6], 1 }
 0x130   :  { %150 = vsyncpa [#allocation4], 1 }

</bundles_post_ra>
